<compile_context>
chip_gen: v7x
topology: tpu7x:2x2x1
jax: 0.10.0
libtpu: 0.0.40
codegen_flags: <defaults>
</compile_context>

<pallas_src>
import jax
import jax.numpy as jnp
from jax.experimental import pallas as pl
from jax.experimental.pallas import tpu as pltpu


LN_EPS = 1e-5  # PyTorch nn.LayerNorm default


def _critic_kernel(xa_ref, w1_ref, w2_ref, w3_ref, vec_ref, q_ref):
    """Both Q heads fused along the lane axis (2H lanes wide)."""
    f32 = jnp.float32
    H2 = w2_ref.shape[0]          # 2 * hidden_dim (both heads side by side)
    H = H2 // 2

    xa = xa_ref[...]              # [B, d_in], bf16

    # Packed per-head vectors: rows of one [5, 2H] slab (single DMA).
    b1 = vec_ref[0:1, :].astype(f32)      # [1, 2H]
    gamma = vec_ref[1:2, :].astype(f32)   # [1, 2H]
    beta = vec_ref[2:3, :].astype(f32)    # [1, 2H]
    b2 = vec_ref[3:4, :].astype(f32)      # [1, 2H]
    b3 = vec_ref[4:5, 0:2].astype(f32)    # [1, 2]

    # ---- Linear 1 (both heads in one matmul): [B, d_in] @ [d_in, 2H] ----
    h = jnp.dot(xa, w1_ref[...], preferred_element_type=f32) + b1      # [B, 2H] f32

    # ---- Segmented LayerNorm (per 32-lane head) via block-averaging matmul ----
    row = jax.lax.broadcasted_iota(jnp.int32, (H2, H2), 0)
    col = jax.lax.broadcasted_iota(jnp.int32, (H2, H2), 1)
    avg = jnp.where((row >= H) == (col >= H), 1.0 / H, 0.0).astype(f32)  # [2H, 2H]
    mu = jnp.dot(h, avg, preferred_element_type=f32)        # per-head mean, broadcast
    d = h - mu
    var = jnp.dot(d * d, avg, preferred_element_type=f32)   # per-head biased variance
    hn = d * jax.lax.rsqrt(var + LN_EPS)
    hn = jnp.tanh(hn * gamma + beta)                        # f32, O(1) values

    # ---- Linear 2 + ReLU (block-diagonal weights keep heads independent) ----
    h2 = jnp.dot(hn.astype(jnp.bfloat16), w2_ref[...],
                 preferred_element_type=f32) + b2                        # [B, 2H]
    h2 = jnp.maximum(h2, 0.0)

    # ---- Scalar heads: [B, 2H] @ [2H, 2] -> [B, 2] written directly ----
    q = jnp.dot(h2.astype(jnp.bfloat16), w3_ref[...],
                preferred_element_type=f32) + b3
    q_ref[...] = q.astype(q_ref.dtype)


def critic_forward(obs, action, params):
    """params: packed/fused kernel weights from init_params()[0]."""
    B = obs.shape[0]
    # Concat in the wrapper: at these sizes it is ~1 KiB and fused by XLA;
    # it lets layer 1 be a single [B, d_in] @ [d_in, 2H] matmul (d_in = one K tile).
    xa = jnp.concatenate([obs, action], axis=-1).astype(jnp.bfloat16)
    w1, w2, w3, vec = params["w1"], params["w2"], params["w3"], params["vec"]
    d_in = xa.shape[1]
    H2 = w2.shape[0]

    args = (xa, w1, w2, w3, vec)
    flops = (2 * B * d_in * H2          # linear 1
             + 2 * B * H2 * H2 * 3      # LN averaging x2 + linear 2
             + 2 * B * H2 * 2           # scalar heads
             + 10 * B * H2)             # elementwise
    transcendentals = B * H2 + 2 * B    # tanh + rsqrt
    bytes_accessed = sum(int(a.size) * a.dtype.itemsize for a in args) + B * 2 * 4
    cost = pl.CostEstimate(flops=int(flops), transcendentals=int(transcendentals),
                           bytes_accessed=int(bytes_accessed))
    out_shape = jax.ShapeDtypeStruct((B, 2), jnp.float32)

    if B >= 256 and B % 128 == 0:
        # v7x: batch-parallel grid so both TensorCores take half the batch.
        bm = 256 if (B >= 512 and B % 256 == 0) else 128
        full = lambda i: (0, 0)
        out = pl.pallas_call(
            _critic_kernel,
            out_shape=out_shape,
            grid_spec=pltpu.PrefetchScalarGridSpec(
                num_scalar_prefetch=0,
                grid=(B // bm,),
                in_specs=[pl.BlockSpec((bm, d_in), lambda i: (i, 0)),
                          pl.BlockSpec(w1.shape, full),
                          pl.BlockSpec(w2.shape, full),
                          pl.BlockSpec(w3.shape, full),
                          pl.BlockSpec(vec.shape, full)],
                out_specs=pl.BlockSpec((bm, 2), lambda i: (i, 0)),
            ),
            compiler_params=pltpu.CompilerParams(
                dimension_semantics=("parallel",)),
            cost_estimate=cost,
        )(*args)
    else:
        # Gridless single invocation: everything fits in VMEM with huge headroom.
        vmem = pl.BlockSpec(memory_space=pltpu.MemorySpace.VMEM)
        out = pl.pallas_call(
            _critic_kernel,
            out_shape=out_shape,
            in_specs=[vmem] * len(args),
            out_specs=vmem,
            cost_estimate=cost,
        )(*args)

    return out[:, 0:1], out[:, 1:2]


def init_params(key, obs_dim, action_dim, hidden_dim):
    """Returns (kernel_params, reference_params).

    reference_params are per-head f32 weights exactly matching the PyTorch
    module layout; kernel_params are the lane-fused / packed bf16 weights
    (mathematically identical forward pass).
    """
    d_in = obs_dim + action_dim
    H = hidden_dim
    ks = jax.random.split(key, 6)
    s1 = 1.0 / jnp.sqrt(d_in)
    s2 = 1.0 / jnp.sqrt(H)

    w1 = jax.random.uniform(ks[0], (2, d_in, H), jnp.float32, -s1, s1)
    b1 = jax.random.uniform(ks[1], (2, H), jnp.float32, -s1, s1)
    gamma = jnp.ones((2, H), jnp.float32)     # LayerNorm affine defaults
    beta = jnp.zeros((2, H), jnp.float32)
    w2 = jax.random.uniform(ks[2], (2, H, H), jnp.float32, -s2, s2)
    b2 = jax.random.uniform(ks[3], (2, H), jnp.float32, -s2, s2)
    w3 = jax.random.uniform(ks[4], (2, H), jnp.float32, -s2, s2)   # head rows
    b3 = jax.random.uniform(ks[5], (2,), jnp.float32, -s2, s2)

    ref = dict(w1=w1, b1=b1, gamma=gamma, beta=beta, w2=w2, b2=b2, w3=w3, b3=b3)

    # ---- lane-fused / packed kernel parameters ----
    w1_full = jnp.concatenate([w1[0], w1[1]], axis=1)               # [d_in, 2H]
    w2_bd = jnp.zeros((2 * H, 2 * H), jnp.float32)
    w2_bd = w2_bd.at[:H, :H].set(w2[0]).at[H:, H:].set(w2[1])       # block-diag
    w3_bd = jnp.zeros((2 * H, 2), jnp.float32)
    w3_bd = w3_bd.at[:H, 0].set(w3[0]).at[H:, 1].set(w3[1])         # [2H, 2]
    vec = jnp.zeros((5, 2 * H), jnp.float32)                        # one DMA slab
    vec = vec.at[0].set(jnp.concatenate([b1[0], b1[1]]))
    vec = vec.at[1].set(jnp.concatenate([gamma[0], gamma[1]]))
    vec = vec.at[2].set(jnp.concatenate([beta[0], beta[1]]))
    vec = vec.at[3].set(jnp.concatenate([b2[0], b2[1]]))
    vec = vec.at[4, 0:2].set(b3)

    kern = dict(w1=w1_full.astype(jnp.bfloat16),
                w2=w2_bd.astype(jnp.bfloat16),
                w3=w3_bd.astype(jnp.bfloat16),
                vec=vec)
    return kern, ref


def critic_reference(obs, action, ref):
    """Pure-JAX f32 reference of the PyTorch forward (concat-then-Sequential)."""
    xa = jnp.concatenate([obs, action], axis=-1)
    qs = []
    for i in range(2):
        h = xa @ ref["w1"][i] + ref["b1"][i]
        mu = jnp.mean(h, axis=-1, keepdims=True)
        var = jnp.mean((h - mu) ** 2, axis=-1, keepdims=True)
        h = (h - mu) / jnp.sqrt(var + LN_EPS)
        h = h * ref["gamma"][i] + ref["beta"][i]
        h = jnp.tanh(h)
        h = jnp.maximum(h @ ref["w2"][i] + ref["b2"][i], 0.0)
        qs.append(h @ ref["w3"][i][:, None] + ref["b3"][i])
    return qs[0], qs[1]


if __name__ == "__main__":
    obs_dim, action_dim, hidden_dim = 24, 8, 32

    key = jax.random.PRNGKey(0)
    k_obs, k_act, k_par = jax.random.split(key, 3)
    kern_params, ref_params = init_params(k_par, obs_dim, action_dim, hidden_dim)

    # batch=8 exercises the gridless path; batch=256 exercises the
    # batch-parallel grid path (the one that uses both TCs on v7x).
    for batch in (8, 256):
        obs = jax.random.normal(k_obs, (batch, obs_dim), jnp.float32)
        action = jax.random.normal(k_act, (batch, action_dim), jnp.float32)

        q1, q2 = critic_forward(obs, action, kern_params)
        jax.block_until_ready((q1, q2))

        r1, r2 = critic_reference(obs, action, ref_params)
        assert q1.shape == (batch, 1) and q2.shape == (batch, 1)
        # Tolerance accounts for bf16 matmul operands (accumulation in f32).
        assert jnp.allclose(q1, r1, atol=3e-2, rtol=3e-2)
        assert jnp.allclose(q2, r2, atol=3e-2, rtol=3e-2)

    print("KERNEL_OK")
</pallas_src>

<mosaic_0001>
module attributes {stable_mosaic.version = 11 : i64} {
  func.func @_critic_kernel(%arg0: memref<8x32xbf16, #tpu.memory_space<vmem>>, %arg1: memref<32x64xbf16, #tpu.memory_space<vmem>>, %arg2: memref<64x64xbf16, #tpu.memory_space<vmem>>, %arg3: memref<64x2xbf16, #tpu.memory_space<vmem>>, %arg4: memref<5x64xf32, #tpu.memory_space<vmem>>, %arg5: memref<8x2xf32, #tpu.memory_space<vmem>>) attributes {dimension_semantics = [], scalar_prefetch = 0 : i64, scratch_operands = 0 : i64, tpu.core_type = #tpu.core_type<tc>} {
    %c0 = arith.constant 0 : index
    %c0_0 = arith.constant 0 : index
    %0 = vector.load %arg0[%c0, %c0_0] : memref<8x32xbf16, #tpu.memory_space<vmem>>, vector<8x32xbf16>
    %c0_1 = arith.constant 0 : index
    %c0_2 = arith.constant 0 : index
    %1 = vector.load %arg4[%c0_1, %c0_2] : memref<5x64xf32, #tpu.memory_space<vmem>>, vector<1x64xf32>
    %c1 = arith.constant 1 : index
    %c0_3 = arith.constant 0 : index
    %2 = vector.load %arg4[%c1, %c0_3] : memref<5x64xf32, #tpu.memory_space<vmem>>, vector<1x64xf32>
    %c2 = arith.constant 2 : index
    %c0_4 = arith.constant 0 : index
    %3 = vector.load %arg4[%c2, %c0_4] : memref<5x64xf32, #tpu.memory_space<vmem>>, vector<1x64xf32>
    %c3 = arith.constant 3 : index
    %c0_5 = arith.constant 0 : index
    %4 = vector.load %arg4[%c3, %c0_5] : memref<5x64xf32, #tpu.memory_space<vmem>>, vector<1x64xf32>
    %c4 = arith.constant 4 : index
    %c0_6 = arith.constant 0 : index
    %5 = vector.load %arg4[%c4, %c0_6] : memref<5x64xf32, #tpu.memory_space<vmem>>, vector<1x2xf32>
    %c0_7 = arith.constant 0 : index
    %c0_8 = arith.constant 0 : index
    %6 = vector.load %arg1[%c0_7, %c0_8] : memref<32x64xbf16, #tpu.memory_space<vmem>>, vector<32x64xbf16>
    %cst = arith.constant dense<0.000000e+00> : vector<8x64xf32>
    %7 = tpu.matmul %0, %6, %cst {dimension_numbers = #tpu.dot_dimension_numbers<[1], [0], [0], [1], [0, 0, 1, 1], [], []>} : vector<8x32xbf16>, vector<32x64xbf16>, vector<8x64xf32> -> vector<8x64xf32>
    %8 = vector.broadcast %1 : vector<1x64xf32> to vector<8x64xf32>
    %9 = arith.addf %7, %8 : vector<8x64xf32>
    %10 = tpu.iota {dimensions = array<i32: 0>} : vector<64x64xi32>
    %11 = tpu.iota {dimensions = array<i32: 1>} : vector<64x64xi32>
    %c32_i32 = arith.constant 32 : i32
    %12 = vector.broadcast %c32_i32 : i32 to vector<64x64xi32>
    %13 = arith.cmpi sge, %10, %12 : vector<64x64xi32>
    %c32_i32_9 = arith.constant 32 : i32
    %14 = vector.broadcast %c32_i32_9 : i32 to vector<64x64xi32>
    %15 = arith.cmpi sge, %11, %14 : vector<64x64xi32>
    %16 = arith.xori %13, %15 : vector<64x64xi1>
    %cst_10 = arith.constant dense<true> : vector<64x64xi1>
    %17 = arith.xori %16, %cst_10 : vector<64x64xi1>
    %cst_11 = arith.constant 3.125000e-02 : f32
    %cst_12 = arith.constant 0.000000e+00 : f32
    %18 = vector.broadcast %cst_11 : f32 to vector<64x64xf32>
    %19 = vector.broadcast %cst_12 : f32 to vector<64x64xf32>
    %20 = arith.select %17, %18, %19 : vector<64x64xi1>, vector<64x64xf32>
    %cst_13 = arith.constant dense<0.000000e+00> : vector<8x64xf32>
    %21 = tpu.matmul %9, %20, %cst_13 {dimension_numbers = #tpu.dot_dimension_numbers<[1], [0], [0], [1], [0, 0, 1, 1], [], []>} : vector<8x64xf32>, vector<64x64xf32>, vector<8x64xf32> -> vector<8x64xf32>
    %22 = arith.subf %9, %21 : vector<8x64xf32>
    %23 = arith.mulf %22, %22 : vector<8x64xf32>
    %cst_14 = arith.constant dense<0.000000e+00> : vector<8x64xf32>
    %24 = tpu.matmul %23, %20, %cst_14 {dimension_numbers = #tpu.dot_dimension_numbers<[1], [0], [0], [1], [0, 0, 1, 1], [], []>} : vector<8x64xf32>, vector<64x64xf32>, vector<8x64xf32> -> vector<8x64xf32>
    %cst_15 = arith.constant 9.99999974E-6 : f32
    %25 = vector.broadcast %cst_15 : f32 to vector<8x64xf32>
    %26 = arith.addf %24, %25 : vector<8x64xf32>
    %27 = math.rsqrt %26 : vector<8x64xf32>
    %28 = arith.mulf %22, %27 : vector<8x64xf32>
    %29 = vector.broadcast %2 : vector<1x64xf32> to vector<8x64xf32>
    %30 = arith.mulf %28, %29 : vector<8x64xf32>
    %31 = vector.broadcast %3 : vector<1x64xf32> to vector<8x64xf32>
    %32 = arith.addf %30, %31 : vector<8x64xf32>
    %33 = math.tanh %32 : vector<8x64xf32>
    %34 = arith.truncf %33 : vector<8x64xf32> to vector<8x64xbf16>
    %c0_16 = arith.constant 0 : index
    %c0_17 = arith.constant 0 : index
    %35 = vector.load %arg2[%c0_16, %c0_17] : memref<64x64xbf16, #tpu.memory_space<vmem>>, vector<64x64xbf16>
    %cst_18 = arith.constant dense<0.000000e+00> : vector<8x64xf32>
    %36 = tpu.matmul %34, %35, %cst_18 {dimension_numbers = #tpu.dot_dimension_numbers<[1], [0], [0], [1], [0, 0, 1, 1], [], []>} : vector<8x64xbf16>, vector<64x64xbf16>, vector<8x64xf32> -> vector<8x64xf32>
    %37 = vector.broadcast %4 : vector<1x64xf32> to vector<8x64xf32>
    %38 = arith.addf %36, %37 : vector<8x64xf32>
    %cst_19 = arith.constant 0.000000e+00 : f32
    %39 = vector.broadcast %cst_19 : f32 to vector<8x64xf32>
    %40 = arith.maximumf %38, %39 : vector<8x64xf32>
    %41 = arith.truncf %40 : vector<8x64xf32> to vector<8x64xbf16>
    %c0_20 = arith.constant 0 : index
    %c0_21 = arith.constant 0 : index
    %42 = vector.load %arg3[%c0_20, %c0_21] : memref<64x2xbf16, #tpu.memory_space<vmem>>, vector<64x2xbf16>
    %cst_22 = arith.constant dense<0.000000e+00> : vector<8x2xf32>
    %43 = tpu.matmul %41, %42, %cst_22 {dimension_numbers = #tpu.dot_dimension_numbers<[1], [0], [0], [1], [0, 0, 1, 1], [], []>} : vector<8x64xbf16>, vector<64x2xbf16>, vector<8x2xf32> -> vector<8x2xf32>
    %44 = vector.broadcast %5 : vector<1x2xf32> to vector<8x2xf32>
    %45 = arith.addf %43, %44 : vector<8x2xf32>
    %c0_23 = arith.constant 0 : index
    %c0_24 = arith.constant 0 : index
    %46 = vector.load %arg5[%c0_23, %c0_24] : memref<8x2xf32, #tpu.memory_space<vmem>>, vector<8x2xf32>
    tpu.vector_store %arg5[%c0_23, %c0_24], %45 {strides = array<i32>} : memref<8x2xf32, #tpu.memory_space<vmem>>, vector<8x2xf32>,
    return
  }
}

</mosaic_0001>

<bundles_post_ra>
// kernel: tpu_custom_call.1
= control target key start
LH: loop header
LB: loop body
LE: loop exit
PB: predicated region body
PF: predicated region fallthrough
CT: control target
= control target key end

     0   :  { %10 = vsyncpa [#allocation3], 0  ;;  %s884_s0 = inlined_call_operand.hbm [shape: bf16[8,32], index: 0, kind: input, shape index: {}]   ;;  %s885_s1 = inlined_call_operand.hbm [shape: bf16[32,64], index: 1, kind: input, shape index: {}]   ;;  %s886_s2 = inlined_call_operand.vmem [shape: bf16[64,64], index: 2, kind: input, shape index: {}]   ;;  %s887_s3 = inlined_call_operand.vmem [shape: bf16[64,2], index: 3, kind: input, shape index: {}]   ;;  %s888_s4 = inlined_call_operand.vmem [shape: f32[5,64], index: 4, kind: input, shape index: {}]   ;;  %s889_s5 = inlined_call_operand.vmem [shape: f32[8,2], index: 5, kind: output, shape index: {}]  }
   0x1   :  { %11 = vsyncpa [#allocation5], 0  ;;  %s724_s18 = smov [#allocation2]   ;;  %s725_s20 = smov [#allocation4]  }
   0x2   :  { %s18_s19 = sshll.u32 %s724_s18, 4  ;;  %s27_s21 = sshll.u32 %s725_s20, 4  ;;  %s19_s19 = int_to_ptr.vmem [resolvable:$true] %s18_s19  ;;  %s763_s21 = int_to_ptr.vmem [resolvable:$true] %s27_s21 }
   0x3   :  { %s676_s24 = scalar_lea.hbm %s884_s0, 64 }
   0x4   :  { %p677_p0 = scmp.ne.s32.totalorder %s884_s0, %s676_s24  ;;  %p680_p1 = scmp.lt.u32.totalorder %s676_s24, %s884_s0 }
   0x6   :  { %p682_p2 = pnand %p680_p1, %p677_p0 }
   0x8   :  { %685 = shalt.err (!%p682_p2)
}
   0x9   :  { %s686_s29 = scalar_lea.vmem %s19_s19, 64  ;;  %p691_p4 = scmp.lt.s32.totalorder %s19_s19, %s19_s19 }
   0xa   :  { %p687_p3 = scmp.ne.s32.totalorder %s19_s19, %s686_s29  ;;  %p692_p5 = scmp.lt.s32.totalorder %s686_s29, %s686_s29 }
   0xc   :  { %p693_p6 = por %p692_p5, %p691_p4 }
   0xe   :  { %p694_p7 = pnand %p693_p6, %p687_p3 }
  0x10   :  { %697 = shalt.err (!%p694_p7)
}
  0x11   :  { %21 = dma.hbm_to_vmem [thread:$0]  %s884_s0, 64, %s19_s19, [#allocation3]  }
  0x12   :  { %s698_s9 = scalar_lea.hbm %s885_s1, 256 }
  0x13   :  { %p699_p8 = scmp.ne.s32.totalorder %s885_s1, %s698_s9  ;;  %p702_p9 = scmp.lt.u32.totalorder %s698_s9, %s885_s1 }
  0x15   :  { %p704_p10 = pnand %p702_p9, %p699_p8 }
  0x17   :  { %707 = shalt.err (!%p704_p10)
}
  0x18   :  { %s708_s14 = scalar_lea.vmem %s763_s21, 256  ;;  %p713_p12 = scmp.lt.s32.totalorder %s763_s21, %s763_s21 }
  0x19   :  { %p709_p11 = scmp.ne.s32.totalorder %s763_s21, %s708_s14  ;;  %p714_p13 = scmp.lt.s32.totalorder %s708_s14, %s708_s14 }
  0x1b   :  { %p715_p0 = por %p714_p13, %p713_p12 }
  0x1d   :  { %p716_p1 = pnand %p715_p0, %p709_p11 }
  0x1f   :  { %719 = shalt.err (!%p716_p1)
}
  0x20   :  { %s726_s0 = smov 64   ;;  %s727_s15 = smov 4  }
  0x21   :  { %33 = dma.hbm_to_vmem [thread:$0]  %s885_s1, 256, %s763_s21, [#allocation5], %s726_s0, %s726_s0, %s727_s15  }
  0x22   :  { %720 = dma.done.wait [#allocation3], 64  }
  0x23   :  { %721 = vsyncadd [#allocation3], 4294967232 }
  0x24   :  { %722 = dma.done.wait [#allocation5], 256  }
  0x25   :  { %723 = vsyncadd [#allocation5], 4294967040  ;;  %v728_v0 = vmov 0.0   ;;  %vm729_vm0 = vmmov 0   ;;  %v126_v1 = vlaneseq  ;;  %v730_v2 = vmov 0.0|0.0   ;;  %v662_v4 = vld [vmem:[#allocation4] sm:$0xff]  }
  0x26   :  { %559 = vmatprep.subr.bf16.mxu0 %v728_v0  ;;  %563 = vmatprep.mubr.msk.bf16.mxu0 %vm729_vm0, %v728_v0  ;;  %vm731_vm2 = vmmov 1   ;;  %v663_v5 = vld [vmem:[#allocation4 + $0x8] sm:$0xff]   ;;  %v732_v7 = vmov 0.03125|0.03125   ;;  %v47_v8 = vld [vmem:[#allocation2] sm:$0xf] }
  0x27   :  { %629 = vmatprep.subr.bf16.mxu1 %v730_v2  ;;  %583 = vmatprep.mubr.msk.f32.mxu1 %vm729_vm0, %v728_v0  ;;  %v127_v3 = vand.u32 127, %v126_v1  ;;  %vm73_vm7 = vcmask 261120   ;;  %v492_v10 = vld [vmem:[%s888_s4] ss:$0 sm:$0xff]  ;;  %vm161_vm9 = vcmask 523264   ;;  %v665_v21 = vld [vmem:[%s886_s2 + $0x8] sm:$0xff]  }
  0x28   :  { %560 = vmatpush3.bf16.msra.mxu0 %v662_v4  ;;  %v664_v20 = vld [vmem:[%s886_s2] sm:$0xff]   ;;  %v666_v22 = vld [vmem:[%s886_s2 + $0x10] sm:$0xff]   ;;  %v667_v23 = vld [vmem:[%s886_s2 + $0x18] sm:$0xff]   ;;  %vm484_vm10 = vcmask 15360  }
  0x29   :  { %vm136_vm1 = vcmp.ge.s32.totalorder %v127_v3, 32  ;;  %561 = vmatprep.subr.bf16.mxu0 %v728_v0  ;;  %v668_v24 = vld [vmem:[%s887_s3] sm:$0xff]   ;;  %v669_v25 = vld [vmem:[%s887_s3 + $0x8] sm:$0xff]   ;;  %v670_v37 = vld [vmem:[%s887_s3 + $0x10] sm:$0xff]  }
  0x2a   :  { %vm145_vm3 = vmxor %vm136_vm1, %vm731_vm2  ;;  %v514_v30 = vld [vmem:[%s888_s4 + $0x1] ss:$0 sm:$0xff]  ;;  %v515_v32 = vld [vmem:[%s888_s4 + $0x2] ss:$0 sm:$0xff] }
  0x2b   :  { %vm799_vm4 = vmpackc.low %vm145_vm3, %vm145_vm3  ;;  %v671_v38 = vld [vmem:[%s887_s3 + $0x18] sm:$0xff]   ;;  %v516_v39 = vld [vmem:[%s888_s4 + $0x3] ss:$0 sm:$0xff] }
  0x2c   :  { %631 = vmatpush3.bf16.msk.msra.mxu1 %vm799_vm4, %v732_v7  ;;  %vm141_vm5 = vmxor %vm731_vm2, %vm136_vm1  ;;  %562 = vmatpush3.bf16.msra.mxu0 %v663_v5  ;;  %v522_v47 = vld [vmem:[%s888_s4 + $0x4] ss:$0 sm:$0xff] }
  0x2d   :  { %632 = vmatprep.subr.bf16.mxu1 %v730_v2  ;;  %vm149_vm6 = vmxor %vm141_vm5, %vm731_vm2  ;;  %641 = vmatprep.subr.bf16.mxu0 %v730_v2 }
  0x2e   :  { %vm806_vm8 = vmpackc.low %vm149_vm6, %vm149_vm6 }
  0x2f   :  { %564 = vmatmul.mubr.msk.bf16.vlgmr.msra.gmra.mrb[0].mxu0 %vm73_vm7, %v47_v8 }
  0x30   :  { %634 = vmatpush3.bf16.msk.msra.mxu1 %vm799_vm4, %v732_v7  ;;  %643 = vmatpush3.bf16.msk.msra.mxu0 %vm799_vm4, %v732_v7 }
  0x31   :  { %635 = vmatprep.subr.bf16.mxu1 %v730_v2  ;;  %602 = vmatprep.mubr.msk.f32.mxu0 %vm729_vm0, %v728_v0 }
  0x32   :  { %644 = vmatprep.subr.bf16.mxu0 %v730_v2 }
  0x34   :  { %637 = vmatpush3.bf16.msk.msra.mxu1 %vm806_vm8, %v732_v7  ;;  %646 = vmatpush3.bf16.msk.msra.mxu0 %vm799_vm4, %v732_v7 }
  0x35   :  { %638 = vmatprep.subr.bf16.mxu1 %v730_v2  ;;  %647 = vmatprep.subr.bf16.mxu0 %v730_v2 }
  0x38   :  { %640 = vmatpush3.bf16.msk.msra.mxu1 %vm806_vm8, %v732_v7  ;;  %649 = vmatpush3.bf16.msk.msra.mxu0 %vm806_vm8, %v732_v7 }
  0x39   :  { %605 = vmatprep.subr.bf16.mxu1 %v728_v0  ;;  %650 = vmatprep.subr.bf16.mxu0 %v730_v2 }
  0x3c   :  { %652 = vmatpush3.bf16.msk.msra.mxu0 %vm806_vm8, %v732_v7 }
  0x3d   :  { %617 = vmatprep.subr.bf16.mxu0 %v728_v0 }
 0x102   :  { %v111_v11 = vpop.f32.mrb[0].mxu0 }
 0x103   :  { %v112_v12 = vadd.f32 %v492_v10, %v111_v11  ;;  %v565_v13 = vpop.f32.mrb[1].mxu0 }
 0x104   :  { %v114_v14 = vpop.f32.mrb[2].mxu0 }
 0x105   :  { %v566_v15 = vpop.f32.mrb[3].mxu0  ;;  %584 = vmatmul.mubr.msk.f32.vlgmr.msra.gmra.mrb[0].mxu1 %vm161_vm9, %v112_v12 }
 0x106   :  { %613 = vmatprep.mubr.msk.bf16.mxu1 %vm729_vm0, %v728_v0  ;;  %606 = vmatpush3.bf16.msra.mxu1 %v664_v20 }
 0x107   :  { %607 = vmatprep.subr.bf16.mxu1 %v728_v0 }
 0x10a   :  { %608 = vmatpush3.bf16.msra.mxu1 %v665_v21 }
 0x10b   :  { %609 = vmatprep.subr.bf16.mxu1 %v728_v0 }
 0x10e   :  { %610 = vmatpush3.bf16.msra.mxu1 %v666_v22 }
 0x10f   :  { %611 = vmatprep.subr.bf16.mxu1 %v728_v0 }
 0x112   :  { %612 = vmatpush3.bf16.msra.mxu1 %v667_v23 }
 0x1d8   :  { %v231_v16 = vpop.f32.mrb[0].mxu1 }
 0x1d9   :  { %v235_v17 = vsub.f32 %v112_v12, %v231_v16  ;;  %v585_v18 = vpop.f32.mrb[1].mxu1 }
 0x1db   :  { %v236_v19 = vmul.f32 %v235_v17, %v235_v17 }
 0x1dd   :  { %603 = vmatmul.mubr.msk.f32.vlgmr.msra.gmra.mrb[4].mxu0 %vm161_vm9, %v236_v19 }
 0x1de   :  { %625 = vmatprep.mubr.msk.bf16.mxu0 %vm729_vm0, %v728_v0  ;;  %618 = vmatpush3.bf16.msra.mxu0 %v668_v24 }
 0x1df   :  { %619 = vmatprep.subr.bf16.mxu0 %v728_v0 }
 0x1e2   :  { %620 = vmatpush3.bf16.msra.mxu0 %v669_v25 }
 0x1e3   :  { %621 = vmatprep.subr.bf16.mxu0 %v728_v0 }
 0x1e6   :  { %622 = vmatpush3.bf16.msra.mxu0 %v670_v37 }
 0x1e7   :  { %623 = vmatprep.subr.bf16.mxu0 %v728_v0 }
 0x1ea   :  { %624 = vmatpush3.bf16.msra.mxu0 %v671_v38 }
 0x2b0   :  { %v306_v26 = vpop.f32.mrb[4].mxu0 }
 0x2b1   :  { %v307_v27 = vadd.f32 1e-05, %v306_v26  ;;  %v604_v28 = vpop.f32.mrb[5].mxu0 }
 0x2b3   :  { %672 = vrsqrt.f32 %v307_v27 }
 0x2bd   :  { %v673_v29 = vpop.eup %672 }
 0x2be   :  { %v311_v31 = vmul.f32 %v673_v29, %v235_v17 }
 0x2c0   :  { %v316_v33 = vmul.f32 %v514_v30, %v311_v31 }
 0x2c2   :  { %v321_v34 = vadd.f32 %v515_v32, %v316_v33 }
 0x2c4   :  { %674 = vtanh.f32 %v321_v34 }
 0x2ce   :  { %v675_v35 = vpop.eup %674 }
 0x2cf   :  { %v323_v36 = vpack.c.bf16 %v675_v35, %v675_v35 }
 0x2d1   :  { %614 = vmatmul.mubr.msk.bf16.vlgmr.msra.gmra.mrb[4].mxu1 %vm161_vm9, %v323_v36 }
 0x3a4   :  { %v397_v40 = vpop.f32.mrb[4].mxu1 }
 0x3a5   :  { %v398_v41 = vadd.f32 %v516_v39, %v397_v40  ;;  %v615_v42 = vpop.f32.mrb[5].mxu1 }
 0x3a6   :  { %v400_v43 = vpop.f32.mrb[6].mxu1 }
 0x3a7   :  { %v403_v44 = vmax.f32 %v398_v41, 0.0  ;;  %v616_v45 = vpop.f32.mrb[7].mxu1 }
 0x3a9   :  { %v404_v46 = vpack.c.bf16 %v403_v44, %v403_v44 }
 0x3ab   :  { %626 = vmatmul.mubr.msk.bf16.vlgmr.msra.gmra.mrb[8].mxu0 %vm161_vm9, %v404_v46 }
 0x47e   :  { %v478_v48 = vpop.f32.mrb[8].mxu0 }
 0x47f   :  { %v479_v49 = vadd.f32 %v522_v47, %v478_v48  ;;  %v627_v50 = vpop.f32.mrb[9].mxu0 }
 0x480   :  { %v481_v51 = vpop.f32.mrb[10].mxu0 }
 0x481   :  { %485 = vst.msk [vmem:[%s889_s5] sm:$0xff] %vm484_vm10, %v479_v49  ;;  %v628_v52 = vpop.f32.mrb[11].mxu0 }
 0x482   :  { %490 = vsyncpa [#allocation3], 1 }
 0x483   :  { %491 = vsyncpa [#allocation5], 1 }

</bundles_post_ra>
